<compile_context>
chip_gen: v5e
topology: v5e:2x2
jax: 0.10.0
libtpu: 0.0.40
codegen_flags: <defaults>
</compile_context>

<pallas_src>
import jax
import jax.numpy as jnp
from jax.experimental import pallas as pl
from jax.experimental.pallas import tpu as pltpu

_NEG_BIG = -1e30  # finite "minus infinity" for padded vocab columns.
                  # Must stay finite and f32: -inf would NaN the online lse,
                  # and -1e30 overflows bf16.


def _round_up(v, m):
    return ((v + m - 1) // m) * m


def _vmem_capacity_bytes():
    try:
        cap = getattr(pltpu.get_tpu_info(), "vmem_capacity_bytes", None)
        if cap:
            return int(cap)
    except Exception:
        pass
    return 64 * 1024 * 1024  # conservative default (v7x per-TensorCore)


def _vmem_limit(need_bytes):
    """Scoped-VMEM limit: footprint + headroom, clamped to physical VMEM."""
    cap = _vmem_capacity_bytes()
    limit = max(need_bytes + max(2 << 20, need_bytes // 4), 32 << 20)
    limit = min(limit, max(cap - (8 << 20), need_bytes + (2 << 20)))
    return int(limit)


# ---------------------------------------------------------------------------
# Kernel 1: per-tile raw logits + online log-sum-exp.
# ---------------------------------------------------------------------------
def _logits_lse_kernel(x_ref, w_ref, b_ref, logits_ref, lse_ref, m_ref, l_ref):
    # x_ref:       (tm, d_model)   bf16  (resident per row block)
    # w_ref:       (tn, d_model)   bf16  (PyTorch-native layout tile)
    # b_ref:       (1, vocab_pad)  f32   (resident, fetched once)
    # logits_ref:  (tm, tn)        f32   (per-(i, j) output block)
    # lse_ref:     (tm, 1)         f32   (resident across the vocab axis)
    # m_ref/l_ref: (tm, 1)         f32   running max / running sum-exp
    j = pl.program_id(1)
    nj = pl.num_programs(1)
    tn = w_ref.shape[0]

    @pl.when(j == 0)
    def _init():
        m_ref[...] = jnp.full_like(m_ref, -jnp.inf)
        l_ref[...] = jnp.zeros_like(l_ref)

    col = pl.multiple_of(j * tn, 128)
    # bf16 x bf16 -> f32 on the MXU; contraction over d_model (x @ W_tile^T).
    logits = jax.lax.dot_general(
        x_ref[...], w_ref[...],
        dimension_numbers=(((1,), (1,)), ((), ())),
        preferred_element_type=jnp.float32,
    ) + b_ref[:, pl.ds(col, tn)]

    logits_ref[...] = logits

    # Online log-sum-exp update (all f32).
    m_prev = m_ref[...]
    m_new = jnp.maximum(m_prev, jnp.max(logits, axis=-1, keepdims=True))
    l_ref[...] = (l_ref[...] * jnp.exp(m_prev - m_new)
                  + jnp.sum(jnp.exp(logits - m_new), axis=-1, keepdims=True))
    m_ref[...] = m_new

    @pl.when(j == nj - 1)
    def _finalize():
        lse_ref[...] = m_ref[...] + jnp.log(l_ref[...])


# ---------------------------------------------------------------------------
# Kernel 2: log_probs = logits - lse (mem-bound, in-place when dtypes match).
# ---------------------------------------------------------------------------
def _normalize_kernel(logits_ref, lse_ref, o_ref):
    o_ref[...] = (logits_ref[...] - lse_ref[...]).astype(o_ref.dtype)


def make_generator(w, b, *, tm=512, tn=1024, out_dtype=jnp.float32):
    """Build the Generator forward pass.

    w: (vocab, d_model) -- PyTorch nn.Linear weight, native layout (no transpose).
    b: (vocab,)
    Returns forward(x) computing log_softmax(x @ w.T + b, axis=-1).
    """
    vocab, d_model = w.shape
    assert b.shape == (vocab,)
    assert tm % 8 == 0 and tn % 128 == 0

    tn_eff_cfg = min(tn, _round_up(vocab, 128))
    vocab_pad = _round_up(vocab, tn_eff_cfg)

    # ---- one-time weight prep (hoisted out of the per-call forward path) ----
    w_p = w.astype(jnp.bfloat16)
    b_p = b.reshape(1, vocab).astype(jnp.float32)
    if vocab_pad != vocab:
        w_p = jnp.pad(w_p, ((0, vocab_pad - vocab), (0, 0)))
        b_p = jnp.pad(b_p, ((0, 0), (0, vocab_pad - vocab)),
                      constant_values=_NEG_BIG)
    w_p, b_p = jax.device_put((w_p, b_p))

    @jax.jit
    def _fwd(x, w_pad, b_pad):
        lead = x.shape[:-1]
        n = 1
        for s in lead:
            n *= s
        tn_eff = tn_eff_cfg

        # Row tiling: clamp to the problem; keep >= 2 row blocks so the
        # "parallel" axis actually shards across both v7x TensorCores.
        tm_eff = min(tm, _round_up(n, 8))
        if n > 8 and pl.cdiv(n, tm_eff) < 2:
            tm_eff = _round_up(pl.cdiv(n, 2), 8)
        n_pad = _round_up(n, tm_eff)

        x2 = x.reshape(n, d_model).astype(jnp.bfloat16)
        if n_pad != n:
            x2 = jnp.pad(x2, ((0, n_pad - n), (0, 0)))

        grid = (n_pad // tm_eff, vocab_pad // tn_eff)

        # VMEM footprint of kernel 1 (double-buffered tiles).
        need1 = (2 * tm_eff * d_model * 2      # x tile (bf16) x2 buffers
                 + 2 * tn_eff * d_model * 2    # W tile (bf16) x2 buffers
                 + 2 * vocab_pad * 4           # resident bias
                 + 2 * tm_eff * tn_eff * 4     # logits output tile x2 buffers
                 + 4 * tm_eff * 4)             # lse output + (m, l) scratch

        logits, lse = pl.pallas_call(
            _logits_lse_kernel,
            out_shape=(
                jax.ShapeDtypeStruct((n_pad, vocab_pad), jnp.float32),
                jax.ShapeDtypeStruct((n_pad, 1), jnp.float32),
            ),
            grid_spec=pltpu.PrefetchScalarGridSpec(
                num_scalar_prefetch=0,
                grid=grid,
                in_specs=[
                    pl.BlockSpec((tm_eff, d_model), lambda i, j: (i, 0)),  # x rows
                    pl.BlockSpec((tn_eff, d_model), lambda i, j: (j, 0)),  # W tile
                    pl.BlockSpec((1, vocab_pad), lambda i, j: (0, 0)),     # bias
                ],
                out_specs=[
                    pl.BlockSpec((tm_eff, tn_eff), lambda i, j: (i, j)),   # logits
                    pl.BlockSpec((tm_eff, 1), lambda i, j: (i, 0)),        # lse
                ],
                scratch_shapes=[
                    pltpu.VMEM((tm_eff, 1), jnp.float32),  # running max
                    pltpu.VMEM((tm_eff, 1), jnp.float32),  # running sum-exp
                ],
            ),
            compiler_params=pltpu.CompilerParams(
                dimension_semantics=("parallel", "arbitrary"),
                vmem_limit_bytes=_vmem_limit(need1),
            ),
        )(x2, w_pad, b_pad)

        need2 = 4 * tm_eff * tn_eff * 4 + 4 * tm_eff * 4
        alias = ({0: 0} if jnp.dtype(out_dtype) == jnp.dtype(jnp.float32)
                 else {})

        out = pl.pallas_call(
            _normalize_kernel,
            out_shape=jax.ShapeDtypeStruct((n_pad, vocab_pad), out_dtype),
            grid_spec=pltpu.PrefetchScalarGridSpec(
                num_scalar_prefetch=0,
                grid=grid,
                in_specs=[
                    pl.BlockSpec((tm_eff, tn_eff), lambda i, j: (i, j)),
                    pl.BlockSpec((tm_eff, 1), lambda i, j: (i, 0)),
                ],
                out_specs=pl.BlockSpec((tm_eff, tn_eff), lambda i, j: (i, j)),
            ),
            compiler_params=pltpu.CompilerParams(
                dimension_semantics=("parallel", "parallel"),
                vmem_limit_bytes=_vmem_limit(need2),
            ),
            input_output_aliases=alias,
        )(logits, lse)

        return out[:n, :vocab].reshape(*lead, vocab)

    def forward(x):
        return _fwd(x, w_p, b_p)

    return forward


def _reference(x, w, b):
    # Same bf16 matmul operands as the kernel, f32 math, for a tight comparison.
    xb = x.astype(jnp.bfloat16).astype(jnp.float32)
    wb = w.astype(jnp.bfloat16).astype(jnp.float32)
    return jax.nn.log_softmax(xb @ wb.T + b, axis=-1)


if __name__ == "__main__":
    key = jax.random.PRNGKey(0)

    # --- test 1: small toy shapes (vocab padded 16 -> 128 internally) ---
    batch, seq, d_model, vocab = 2, 8, 32, 16
    kx, kw, kb, key = jax.random.split(key, 4)
    x = jax.random.normal(kx, (batch, seq, d_model), dtype=jnp.float32)
    w = jax.random.normal(kw, (vocab, d_model), dtype=jnp.float32) * (1.0 / d_model ** 0.5)
    b = jax.random.normal(kb, (vocab,), dtype=jnp.float32) * 0.01

    gen = make_generator(w, b)
    y = jax.block_until_ready(gen(x))
    ref = _reference(x, w, b)
    assert y.shape == (batch, seq, vocab)
    assert jnp.allclose(y, ref, atol=1e-3, rtol=1e-3), float(jnp.max(jnp.abs(y - ref)))

    # --- test 2: ragged shapes exercising row padding + multi-tile vocab
    #     (tn=128 forces the online log-sum-exp across several vocab tiles) ---
    batch2, seq2, d_model2, vocab2 = 2, 9, 32, 300
    kx, kw, kb, key = jax.random.split(key, 4)
    x2 = jax.random.normal(kx, (batch2, seq2, d_model2), dtype=jnp.float32)
    w2 = jax.random.normal(kw, (vocab2, d_model2), dtype=jnp.float32) * (1.0 / d_model2 ** 0.5)
    b2 = jax.random.normal(kb, (vocab2,), dtype=jnp.float32) * 0.01

    gen2 = make_generator(w2, b2, tn=128)
    y2 = jax.block_until_ready(gen2(x2))
    ref2 = _reference(x2, w2, b2)
    assert y2.shape == (batch2, seq2, vocab2)
    assert jnp.allclose(y2, ref2, atol=1e-3, rtol=1e-3), float(jnp.max(jnp.abs(y2 - ref2)))

    print("KERNEL_OK")
</pallas_src>

<mosaic_0001>
module attributes {stable_mosaic.version = 11 : i64} {
  func.func @_normalize_kernel(%arg0: i32, %arg1: i32, %arg2: memref<8x128xf32, #tpu.memory_space<vmem>>, %arg3: memref<8x1xf32, #tpu.memory_space<vmem>>, %arg4: memref<8x128xf32, #tpu.memory_space<vmem>>) attributes {dimension_semantics = [#tpu.dimension_semantics<parallel>, #tpu.dimension_semantics<parallel>], iteration_bounds = array<i64: 2, 1>, scalar_prefetch = 0 : i64, scratch_operands = 0 : i64, tpu.core_type = #tpu.core_type<tc>, window_params = [{transform_indices = @transform_0, window_bounds = array<i64: 8, 128>}, {transform_indices = @transform_1, window_bounds = array<i64: 8, 1>}, {transform_indices = @transform_2, window_bounds = array<i64: 8, 128>}]} {
    %c0 = arith.constant 0 : index
    %c0_0 = arith.constant 0 : index
    %0 = vector.load %arg2[%c0, %c0_0] : memref<8x128xf32, #tpu.memory_space<vmem>>, vector<8x128xf32>
    %c0_1 = arith.constant 0 : index
    %c0_2 = arith.constant 0 : index
    %1 = vector.load %arg3[%c0_1, %c0_2] : memref<8x1xf32, #tpu.memory_space<vmem>>, vector<8x1xf32>
    %2 = vector.broadcast %1 : vector<8x1xf32> to vector<8x128xf32>
    %3 = arith.subf %0, %2 : vector<8x128xf32>
    %c0_3 = arith.constant 0 : index
    %c0_4 = arith.constant 0 : index
    %4 = vector.load %arg4[%c0_3, %c0_4] : memref<8x128xf32, #tpu.memory_space<vmem>>, vector<8x128xf32>
    tpu.vector_store %arg4[%c0_3, %c0_4], %3 {strides = array<i32>} : memref<8x128xf32, #tpu.memory_space<vmem>>, vector<8x128xf32>,
    return
  }
  func.func @transform_0(%arg0: i32, %arg1: i32) -> (i32, i32) {
    %c0_i32 = arith.constant 0 : i32
    return %arg0, %arg1 : i32, i32
  }
  func.func @transform_1(%arg0: i32, %arg1: i32) -> (i32, i32) {
    %c0_i32 = arith.constant 0 : i32
    %c0_i32_0 = arith.constant 0 : i32
    return %arg0, %c0_i32 : i32, i32
  }
  func.func @transform_2(%arg0: i32, %arg1: i32) -> (i32, i32) {
    %c0_i32 = arith.constant 0 : i32
    return %arg0, %arg1 : i32, i32
  }
}

module attributes {stable_mosaic.version = 11 : i64} {
  func.func @_logits_lse_kernel(%arg0: i32, %arg1: i32, %arg2: memref<8x32xbf16, #tpu.memory_space<vmem>>, %arg3: memref<128x32xbf16, #tpu.memory_space<vmem>>, %arg4: memref<1x128xf32, #tpu.memory_space<vmem>>, %arg5: memref<8x128xf32, #tpu.memory_space<vmem>>, %arg6: memref<8x1xf32, #tpu.memory_space<vmem>>, %arg7: memref<8x1xf32, #tpu.memory_space<vmem>>, %arg8: memref<8x1xf32, #tpu.memory_space<vmem>>) attributes {dimension_semantics = [#tpu.dimension_semantics<parallel>, #tpu.dimension_semantics<arbitrary>], iteration_bounds = array<i64: 2, 1>, scalar_prefetch = 0 : i64, scratch_operands = 2 : i64, tpu.core_type = #tpu.core_type<tc>, window_params = [{transform_indices = @transform_0, window_bounds = array<i64: 8, 32>}, {transform_indices = @transform_1, window_bounds = array<i64: 128, 32>}, {pipeline_mode = #tpu.pipeline_mode<synchronous>, transform_indices = @transform_2, window_bounds = array<i64: 1, 128>}, {transform_indices = @transform_3, window_bounds = array<i64: 8, 128>}, {transform_indices = @transform_4, window_bounds = array<i64: 8, 1>}]} {
    %c0_i32 = arith.constant 0 : i32
    %0 = arith.cmpi eq, %arg1, %c0_i32 : i32
    %1 = arith.extui %0 : i1 to i32
    %c0_i32_0 = arith.constant 0 : i32
    %2 = arith.cmpi ne, %1, %c0_i32_0 : i32
    scf.if %2 {
      %cst_19 = arith.constant 0xFF800000 : f32
      %32 = vector.broadcast %cst_19 : f32 to vector<8x1xf32>
      %c0_20 = arith.constant 0 : index
      %c0_21 = arith.constant 0 : index
      %33 = vector.load %arg7[%c0_20, %c0_21] : memref<8x1xf32, #tpu.memory_space<vmem>>, vector<8x1xf32>
      tpu.vector_store %arg7[%c0_20, %c0_21], %32 {strides = array<i32>} : memref<8x1xf32, #tpu.memory_space<vmem>>, vector<8x1xf32>,
      %cst_22 = arith.constant 0.000000e+00 : f32
      %34 = vector.broadcast %cst_22 : f32 to vector<8x1xf32>
      %c0_23 = arith.constant 0 : index
      %c0_24 = arith.constant 0 : index
      %35 = vector.load %arg8[%c0_23, %c0_24] : memref<8x1xf32, #tpu.memory_space<vmem>>, vector<8x1xf32>
      tpu.vector_store %arg8[%c0_23, %c0_24], %34 {strides = array<i32>} : memref<8x1xf32, #tpu.memory_space<vmem>>, vector<8x1xf32>,
    } else {
    }
    %c128_i32 = arith.constant 128 : i32
    %3 = arith.muli %arg1, %c128_i32 : i32
    %4 = tpu.assume_multiple %3, 128 : i32
    %c0 = arith.constant 0 : index
    %c0_1 = arith.constant 0 : index
    %5 = vector.load %arg2[%c0, %c0_1] : memref<8x32xbf16, #tpu.memory_space<vmem>>, vector<8x32xbf16>
    %c0_2 = arith.constant 0 : index
    %c0_3 = arith.constant 0 : index
    %6 = vector.load %arg3[%c0_2, %c0_3] : memref<128x32xbf16, #tpu.memory_space<vmem>>, vector<128x32xbf16>
    %cst = arith.constant dense<0.000000e+00> : vector<8x128xf32>
    %7 = tpu.matmul %5, %6, %cst {dimension_numbers = #tpu.dot_dimension_numbers<[1], [1], [0], [0], [0, 0, 1, 0], [], []>} : vector<8x32xbf16>, vector<128x32xbf16>, vector<8x128xf32> -> vector<8x128xf32>
    %c0_4 = arith.constant 0 : index
    %8 = arith.index_cast %4 : i32 to index
    %9 = vector.load %arg4[%c0_4, %8] : memref<1x128xf32, #tpu.memory_space<vmem>>, vector<1x128xf32>
    %10 = vector.broadcast %9 : vector<1x128xf32> to vector<8x128xf32>
    %11 = arith.addf %7, %10 : vector<8x128xf32>
    %c0_5 = arith.constant 0 : index
    %c0_6 = arith.constant 0 : index
    %12 = vector.load %arg5[%c0_5, %c0_6] : memref<8x128xf32, #tpu.memory_space<vmem>>, vector<8x128xf32>
    tpu.vector_store %arg5[%c0_5, %c0_6], %11 {strides = array<i32>} : memref<8x128xf32, #tpu.memory_space<vmem>>, vector<8x128xf32>,
    %c0_7 = arith.constant 0 : index
    %c0_8 = arith.constant 0 : index
    %13 = vector.load %arg7[%c0_7, %c0_8] : memref<8x1xf32, #tpu.memory_space<vmem>>, vector<8x1xf32>
    %cst_9 = arith.constant dense<0xFF800000> : vector<8xf32>
    %14 = vector.multi_reduction <maximumf>, %11, %cst_9 [1] : vector<8x128xf32> to vector<8xf32>
    %15 = vector.shape_cast %14 : vector<8xf32> to vector<8x1xf32>
    %16 = arith.maximumf %13, %15 : vector<8x1xf32>
    %c0_10 = arith.constant 0 : index
    %c0_11 = arith.constant 0 : index
    %17 = vector.load %arg8[%c0_10, %c0_11] : memref<8x1xf32, #tpu.memory_space<vmem>>, vector<8x1xf32>
    %18 = arith.subf %13, %16 : vector<8x1xf32>
    %19 = math.exp %18 : vector<8x1xf32>
    %20 = arith.mulf %17, %19 : vector<8x1xf32>
    %21 = vector.broadcast %16 : vector<8x1xf32> to vector<8x128xf32>
    %22 = arith.subf %11, %21 : vector<8x128xf32>
    %23 = math.exp %22 : vector<8x128xf32>
    %cst_12 = arith.constant dense<0.000000e+00> : vector<8xf32>
    %24 = vector.multi_reduction <add>, %23, %cst_12 [1] : vector<8x128xf32> to vector<8xf32>
    %25 = vector.shape_cast %24 : vector<8xf32> to vector<8x1xf32>
    %26 = arith.addf %20, %25 : vector<8x1xf32>
    %c0_13 = arith.constant 0 : index
    %c0_14 = arith.constant 0 : index
    %27 = vector.load %arg8[%c0_13, %c0_14] : memref<8x1xf32, #tpu.memory_space<vmem>>, vector<8x1xf32>
    tpu.vector_store %arg8[%c0_13, %c0_14], %26 {strides = array<i32>} : memref<8x1xf32, #tpu.memory_space<vmem>>, vector<8x1xf32>,
    %c0_15 = arith.constant 0 : index
    %c0_16 = arith.constant 0 : index
    %28 = vector.load %arg7[%c0_15, %c0_16] : memref<8x1xf32, #tpu.memory_space<vmem>>, vector<8x1xf32>
    tpu.vector_store %arg7[%c0_15, %c0_16], %16 {strides = array<i32>} : memref<8x1xf32, #tpu.memory_space<vmem>>, vector<8x1xf32>,
    %c0_i32_17 = arith.constant 0 : i32
    %29 = arith.cmpi eq, %arg1, %c0_i32_17 : i32
    %30 = arith.extui %29 : i1 to i32
    %c0_i32_18 = arith.constant 0 : i32
    %31 = arith.cmpi ne, %30, %c0_i32_18 : i32
    scf.if %31 {
      %c0_19 = arith.constant 0 : index
      %c0_20 = arith.constant 0 : index
      %32 = vector.load %arg7[%c0_19, %c0_20] : memref<8x1xf32, #tpu.memory_space<vmem>>, vector<8x1xf32>
      %c0_21 = arith.constant 0 : index
      %c0_22 = arith.constant 0 : index
      %33 = vector.load %arg8[%c0_21, %c0_22] : memref<8x1xf32, #tpu.memory_space<vmem>>, vector<8x1xf32>
      %34 = math.log %33 : vector<8x1xf32>
      %35 = arith.addf %32, %34 : vector<8x1xf32>
      %c0_23 = arith.constant 0 : index
      %c0_24 = arith.constant 0 : index
      %36 = vector.load %arg6[%c0_23, %c0_24] : memref<8x1xf32, #tpu.memory_space<vmem>>, vector<8x1xf32>
      tpu.vector_store %arg6[%c0_23, %c0_24], %35 {strides = array<i32>} : memref<8x1xf32, #tpu.memory_space<vmem>>, vector<8x1xf32>,
    } else {
    }
    return
  }
  func.func @transform_0(%arg0: i32, %arg1: i32) -> (i32, i32) {
    %c0_i32 = arith.constant 0 : i32
    %c0_i32_0 = arith.constant 0 : i32
    return %arg0, %c0_i32 : i32, i32
  }
  func.func @transform_1(%arg0: i32, %arg1: i32) -> (i32, i32) {
    %c0_i32 = arith.constant 0 : i32
    %c0_i32_0 = arith.constant 0 : i32
    return %arg1, %c0_i32 : i32, i32
  }
  func.func @transform_2(%arg0: i32, %arg1: i32) -> (i32, i32) {
    %c0_i32 = arith.constant 0 : i32
    %c0_i32_0 = arith.constant 0 : i32
    %c0_i32_1 = arith.constant 0 : i32
    return %c0_i32, %c0_i32_0 : i32, i32
  }
  func.func @transform_3(%arg0: i32, %arg1: i32) -> (i32, i32) {
    %c0_i32 = arith.constant 0 : i32
    return %arg0, %arg1 : i32, i32
  }
  func.func @transform_4(%arg0: i32, %arg1: i32) -> (i32, i32) {
    %c0_i32 = arith.constant 0 : i32
    %c0_i32_0 = arith.constant 0 : i32
    return %arg0, %c0_i32 : i32, i32
  }
}

</mosaic_0001>

<bundles_post_ra>
// kernel: _fwd.3
= control target key start
LH: loop header
LB: loop body
LE: loop exit
PB: predicated region body
PF: predicated region fallthrough
CT: control target
= control target key end

     0   :  { %s358_s9 = smov 0   ;;  %s360_s10 = smov 0   ;;  %s382_s0 = inlined_call_operand.vmem [shape: f32[16,128], index: 0, kind: input, shape index: {}, may-alias: {0,2}]   ;;  %s383_s1 = inlined_call_operand.vmem [shape: f32[16,1], index: 1, kind: input, shape index: {}]   ;;  %s384_s2 = inlined_call_operand.vmem [shape: f32[16,128], index: 2, kind: output, shape index: {}, may-alias: {0,2}]  }
   0x1   :  { %s362_s11 = smov 0  }
   0x2 LB: > { %s24_s12 = sadd.s32 1, %s336_s10  ;;  %p286_p0 = scmp.ge.s32.totalorder %s340_s11, 1  ;;  %s340_s11 = sphi %s362_s11, %s12_s11   ;;  %s336_s10 = sphi %s360_s10, %s386_s10   ;;  %s332_s9 = sphi %s358_s9, %s385_s9  }
   0x3   : > { %p26_p1 = scmp.ge.s32.totalorder %s24_s12, 2  ;;  %p139_p2 = scmp.lt.s32.totalorder %s340_s11, 3 }
   0x5   : > { %s388_s12 = smov (%p26_p1, %s24_s12), 0  ;;  %p140_p3 = pnand %p286_p0, %p139_p2 }
   0x6   : > { %p169_p4 = scmp.lt.s32.totalorder (!%p140_p3), %s332_s9, 1 }
   0x7   : > { %143 = sbr.rel (%p140_p3) target bundleno = 134 (0x86), region = 28 }
   0xc   : > { %v342_v0 = vmov 0   ;;  %s390_s9 = smov (!%p169_p4, %s332_s9), 1 }
   0xd   : > { %317 = vset.pattern.permute.xlu0 %v342_v0  ;;  %s287_s13 = sshll.u32 %s390_s9, 3 }
   0xe   : > { %s179_s16 = scalar_lea.vmem %s383_s1, %s287_s13  ;;  %s175_s19 = scalar_lea.vmem %s382_s0, %s287_s13 }
   0xf   : > { %v188_v1 = vld [vmem:[%s179_s16] sm:$0xff]  ;;  %s186_s22 = scalar_lea.vmem %s384_s2, %s287_s13 }
  0x10   : > { %191 = vperm.xlu0 %317, %v188_v1   ;;  %v187_v2 = vld [vmem:[%s175_s19] sm:$0xff] }
  0x82   : > { %v192_v3 = vpop.permute.xlu0 %191 }
  0x83   : > { %v194_v4 = vsub.f32 %v187_v2, %v192_v3 }
  0x85   : > { %195 = vst [vmem:[%s186_s22] sm:$0xff] %v194_v4 }
  0x86 PF: > { %s12_s11 = sadd.s32 1, %s340_s11   ;;  %s385_s9 = smov %s336_s10 }
  0x87   : > { %p9_p5 = scmp.ge.s32.totalorder %s12_s11, 4   ;;  %s386_s10 = smov %s388_s12 }
  0x89   :  { %11 = sbr.rel (!%p9_p5) target bundleno = 2 (0x2), region = 61 }

// kernel: _fwd.2
= control target key start
LH: loop header
LB: loop body
LE: loop exit
PB: predicated region body
PF: predicated region fallthrough
CT: control target
= control target key end

     0   :  { %s650_s15 = smov 0   ;;  %s652_s16 = smov 0   ;;  %s739_s0 = inlined_call_operand.vmem [shape: bf16[16,32], index: 0, kind: input, shape index: {}]   ;;  %s740_s1 = inlined_call_operand.vmem [shape: bf16[128,32], index: 1, kind: input, shape index: {}]   ;;  %s741_s2 = inlined_call_operand.vmem [shape: f32[1,128], index: 2, kind: input, shape index: {}]   ;;  %s742_s3 = inlined_call_operand.vmem [shape: f32[16,128], index: 3, kind: output, shape index: {0}]   ;;  %s743_s4 = inlined_call_operand.vmem [shape: f32[16,1], index: 4, kind: output, shape index: {1}]  }
   0x1   :  { %s654_s17 = smov 0  }
   0x2 LB: > { %s27_s18 = sadd.s32 1, %s616_s16  ;;  %p516_p0 = scmp.ge.s32.totalorder %s620_s17, 1  ;;  %s620_s17 = sphi %s654_s17, %s15_s17   ;;  %s616_s16 = sphi %s652_s16, %s745_s16   ;;  %s612_s15 = sphi %s650_s15, %s744_s15  }
   0x3   : > { %p29_p1 = scmp.ge.s32.totalorder %s27_s18, 2  ;;  %p189_p2 = scmp.lt.s32.totalorder %s620_s17, 3 }
   0x5   : > { %s747_s18 = smov (%p29_p1, %s27_s18), 0  ;;  %p190_p3 = pnand %p516_p0, %p189_p2 }
   0x6   : > { %p225_p4 = scmp.lt.s32.totalorder (!%p190_p3), %s612_s15, 1 }
   0x7   : > { %193 = sbr.rel (%p190_p3) target bundleno = 587 (0x24b), region = 32 }
   0xc   : > { %v562_v0 = vld [vmem:[%s740_s1 + $0x38] sm:$0xff]  ;;  %vm318_vm0 = vcmask 261120   ;;  %v561_v2 = vld [vmem:[%s740_s1 + $0x30] sm:$0xff]  ;;  %v560_v4 = vld [vmem:[%s740_s1 + $0x28] sm:$0xff]  ;;  %s749_s15 = smov (!%p225_p4, %s612_s15), 1  ;;  %vm250_vm1 = vcmask 7168  }
   0xd   : > { %v344_v1 = vsel %vm318_vm0, %v562_v0, 0  ;;  %v341_v3 = vsel %vm318_vm0, %v561_v2, 0  ;;  %v338_v5 = vsel %vm318_vm0, %v560_v4, 0  ;;  %v559_v6 = vld [vmem:[%s740_s1 + $0x20] sm:$0xff]  ;;  %v558_v8 = vld [vmem:[%s740_s1 + $0x18] sm:$0xff]  ;;  %v557_v10 = vld [vmem:[%s740_s1 + $0x10] sm:$0xff] }
   0xe   : > { %346 = vmatpush.bf16.xpose.msra.mxu0 %v344_v1  ;;  %v335_v7 = vsel %vm318_vm0, %v559_v6, 0  ;;  %v332_v9 = vsel %vm318_vm0, %v558_v8, 0  ;;  %v329_v11 = vsel %vm318_vm0, %v557_v10, 0  ;;  %v556_v12 = vld [vmem:[%s740_s1 + $0x8] sm:$0xff]  ;;  %v555_v14 = vld [vmem:[%s740_s1] sm:$0xff]  ;;  %s517_s9 = sshll.u32 %s749_s15, 2 }
   0xf   : > { %v326_v13 = vsel %vm318_vm0, %v556_v12, 0  ;;  %v323_v15 = vsel %vm318_vm0, %v555_v14, 0  ;;  %s228_s12 = scalar_lea.vmem %s739_s0, %s517_s9  ;;  %v622_v17 = vmov -inf   ;;  %s518_s13 = sshll.u32 %s749_s15, 3  ;;  %v591_v18 = vld [vmem:[%s741_s2] ss:$0 sm:$0xff] }
  0x10   : > { %v254_v16 = vld [vmem:[%s228_s12] sm:$0xf]  ;;  %251 = vst.msk [vmem:[#allocation2] sm:$0xff] %vm250_vm1, %v622_v17  ;;  %s241_s22 = scalar_lea.vmem %s742_s3, %s518_s13  ;;  %v623_v22 = vmov 0   ;;  %v624_v23 = vmov 0.0   ;;  %s245_s25 = scalar_lea.vmem %s743_s4, %s518_s13 }
  0x11   : > { %590 = vset.pattern.permute.xlu0 %v623_v22  ;;  %252 = vst.msk [vmem:[#allocation3] sm:$0xff] %vm250_vm1, %v624_v23 }
  0x16   : > { %347 = vmatpush.bf16.xpose.msra.mxu0 %v341_v3 }
  0x17   : > { %v360_v24 = vld [vmem:[#allocation2] sm:$0xff] }
  0x18   : > { %v364_v34 = vld [vmem:[#allocation3] sm:$0xff] }
  0x1e   : > { %348 = vmatpush.bf16.xpose.msra.mxu0 %v338_v5 }
  0x26   : > { %349 = vmatpush.bf16.xpose.msra.mxu0 %v335_v7 }
  0x2e   : > { %350 = vmatpush.bf16.xpose.msra.mxu0 %v332_v9 }
  0x36   : > { %351 = vmatpush.bf16.xpose.msra.mxu0 %v329_v11 }
  0x3e   : > { %352 = vmatpush.bf16.xpose.msra.mxu0 %v326_v13 }
  0x46   : > { %353 = vmatpush.bf16.xpose.msra.mxu0 %v323_v15 }
  0x4d   : > { %552 = vmatmul.msk.bf16.vlgmr.msra.gmra.mxu0 %vm318_vm0, %v254_v16 }
  0xca   : > { %v355_v19 = vpop.f32.mrf.mxu0 }
  0xcb   : > { %v356_v20 = vadd.f32 %v591_v18, %v355_v19 }
  0xcd   : > { %359 = vst [vmem:[%s241_s22] sm:$0xff] %v356_v20  ;;  %361 = vmax.xlane.f32.xlu0 %v356_v20 }
  0xd2   : > { %v357_v21 = vpop.f32.mrf.mxu0 }
 0x140   : > { %v362_v25 = vpop.xlane.xlu0 %361 }
 0x141   : > { %v363_v26 = vmax.f32 %v360_v24, %v362_v25 }
 0x143   : > { %v365_v27 = vsub.f32 %v360_v24, %v363_v26  ;;  %382 = vst.msk [vmem:[#allocation2] sm:$0xff] %vm250_vm1, %v363_v26  ;;  %371 = vperm.xlu0 %590, %v363_v26  }
 0x145   : > { %v366_v32 = vmul.f32 1.442695, %v365_v27 }
 0x14a   : > { %v386_v41 = vld [vmem:[#allocation2] sm:$0xff] }
 0x1b5   : > { %v372_v28 = vpop.permute.xlu0 %371 }
 0x1b6   : > { %v374_v29 = vsub.f32 %v356_v20, %v372_v28 }
 0x1b8   : > { %v375_v30 = vmul.f32 1.442695, %v374_v29 }
 0x1ba   : > { %592 = vpow2.f32 %v375_v30 }
 0x1bb   : > { %594 = vpow2.f32 %v366_v32 }
 0x1c0   : > { %v593_v31 = vpop.eup %592 }
 0x1c1   : > { %377 = vadd.xlane.f32.xlu1 %v593_v31  ;;  %v595_v33 = vpop.eup %594 }
 0x1c2   : > { %v368_v35 = vmul.f32 %v595_v33, %v364_v34 }
 0x234   : > { %v378_v36 = vpop.xlane.xlu1 %377 }
 0x235   : > { %v379_v37 = vadd.f32 %v378_v36, %v368_v35 }
 0x237   : > { %381 = vst.msk [vmem:[#allocation3] sm:$0xff] %vm250_vm1, %v379_v37 }
 0x23e   : > { %v387_v38 = vld [vmem:[#allocation3] sm:$0xff] }
 0x23f   : > { %596 = vlog2.f32 %v387_v38 }
 0x245   : > { %v597_v39 = vpop.eup %596 }
 0x246   : > { %v389_v40 = vmul.f32 0.6931472, %v597_v39 }
 0x248   : > { %v390_v42 = vadd.f32 %v389_v40, %v386_v41 }
 0x24a   : > { %391 = vst.msk [vmem:[%s245_s25] sm:$0xff] %vm250_vm1, %v390_v42 }
 0x24b PF: > { %s15_s17 = sadd.s32 1, %s620_s17   ;;  %s744_s15 = smov %s616_s16 }
 0x24c   : > { %p12_p5 = scmp.ge.s32.totalorder %s15_s17, 4   ;;  %s745_s16 = smov %s747_s18 }
 0x24e   :  { %14 = sbr.rel (!%p12_p5) target bundleno = 2 (0x2), region = 86 }

</bundles_post_ra>
